<compile_context>
chip_gen: v7x
topology: tpu7x:2x2x1
jax: 0.10.0
libtpu: 0.0.40
codegen_flags: <defaults>
</compile_context>

<pallas_src>
import math

import jax
import jax.numpy as jnp
from jax import lax
from jax.experimental import pallas as pl
from jax.experimental.pallas import tpu as pltpu

LANE = 128      # TPU lane width (last dim)
SUBLANE = 8     # f32 sublane count (second-to-last dim)


def _round_up(x, m):
    return ((x + m - 1) // m) * m


# ---------------------------------------------------------------------------
# Kernel: one batch tile, entire Q1 forward fused.
# ---------------------------------------------------------------------------
def q1_kernel(s_ref, a_ref, ws_ref, wa_ref, bh_ref,
              w0_ref, b0_ref, w1_ref, b1_ref, wo_ref, bo_ref, o_ref):
    s = s_ref[...].astype(jnp.float32)
    a = a_ref[...].astype(jnp.float32)

    # features1 = relu([state, action] @ W_h1^T + b_h1)  (concat folded into 2 dots)
    h = jnp.dot(s, ws_ref[...], preferred_element_type=jnp.float32)
    h = h + jnp.dot(a, wa_ref[...], preferred_element_type=jnp.float32)
    h = jnp.maximum(h + bh_ref[...], 0.0)

    # rho_0: relu(h @ W0^T + b0 + h)
    r0 = jnp.dot(h, w0_ref[...], preferred_element_type=jnp.float32) + b0_ref[...] + h
    r0 = jnp.maximum(r0, 0.0)

    # rho_1: relu(r0 @ W1^T + b1 + r0)
    r1 = jnp.dot(r0, w1_ref[...], preferred_element_type=jnp.float32) + b1_ref[...] + r0
    r1 = jnp.maximum(r1, 0.0)

    # output head: r1 @ W_out^T + b_out
    q = jnp.dot(r1, wo_ref[...], preferred_element_type=jnp.float32) + bo_ref[...]
    o_ref[...] = q.astype(o_ref.dtype)


# ---------------------------------------------------------------------------
# Wrapper: batch tiling / padding, pallas_call plumbing.
# ---------------------------------------------------------------------------
def q1_forward(state, action, kernel_params, n_output, *, block_m=128):
    ws, wa, bh, w0, b0, w1, b1, wo, bo = kernel_params
    B = state.shape[0]
    n_state = ws.shape[0]
    n_action = wa.shape[0]
    Fp = ws.shape[1]     # feature dim, already padded to a multiple of 128
    Op = wo.shape[1]     # output dim, already padded to a multiple of 128

    # Batch tile: multiple of 8 sublanes, capped at block_m (128 works across
    # v5e/v6e/v7x; bump to 256 on v6e/v7x for very large batches).
    tm = min(block_m, _round_up(B, SUBLANE))
    Bp = _round_up(B, tm)
    if Bp != B:
        state = jnp.pad(state, ((0, Bp - B), (0, 0)))
        action = jnp.pad(action, ((0, Bp - B), (0, 0)))
    grid = (Bp // tm,)

    batch_spec = lambda cols: pl.BlockSpec((tm, cols), lambda i: (i, 0))
    const_spec = lambda shape: pl.BlockSpec(shape, lambda i: (0, 0))  # VMEM-resident

    n_input = n_state + n_action
    flops = 2 * Bp * (n_input * Fp + 2 * Fp * Fp + Fp * Op)
    bytes_accessed = 4 * (Bp * n_input + n_input * Fp + 2 * Fp * Fp + Fp * Op
                          + 3 * Fp + Op + Bp * Op)

    out = pl.pallas_call(
        q1_kernel,
        out_shape=jax.ShapeDtypeStruct((Bp, Op), jnp.float32),
        grid=grid,
        in_specs=[
            batch_spec(n_state),            # state tile
            batch_spec(n_action),           # action tile
            const_spec((n_state, Fp)),      # W_h1^T (state rows)
            const_spec((n_action, Fp)),     # W_h1^T (action rows)
            const_spec((1, Fp)),            # b_h1
            const_spec((Fp, Fp)),           # W_rho0^T
            const_spec((1, Fp)),            # b_rho0
            const_spec((Fp, Fp)),           # W_rho1^T
            const_spec((1, Fp)),            # b_rho1
            const_spec((Fp, Op)),           # W_out^T
            const_spec((1, Op)),            # b_out
        ],
        out_specs=pl.BlockSpec((tm, Op), lambda i: (i, 0)),
        compiler_params=pltpu.CompilerParams(
            dimension_semantics=("parallel",),       # megacore split on v7x
            vmem_limit_bytes=64 * 1024 * 1024,       # fits every generation's VMEM
        ),
        cost_estimate=pl.CostEstimate(
            flops=flops, transcendentals=0, bytes_accessed=bytes_accessed),
    )(state, action, ws, wa, bh, w0, b0, w1, b1, wo, bo)

    # Drop batch / feature padding, then squeeze like torch.squeeze(q).
    return jnp.squeeze(out[:B, :n_output])


# ---------------------------------------------------------------------------
# Parameter construction (PyTorch-equivalent init) + kernel-layout packing.
# ---------------------------------------------------------------------------
def init_params(key, n_state, n_action, n_features, n_output):
    """Torch-layout params: W has shape (out, in), b has shape (out,)."""
    n_input = n_state + n_action
    ks = jax.random.split(key, 8)

    def xavier(k, fan_out, fan_in, gain):
        bound = gain * math.sqrt(6.0 / (fan_in + fan_out))
        return jax.random.uniform(k, (fan_out, fan_in), jnp.float32, -bound, bound)

    def lin_bias(k, fan_out, fan_in):
        bound = 1.0 / math.sqrt(fan_in)
        return jax.random.uniform(k, (fan_out,), jnp.float32, -bound, bound)

    g_relu, g_lin = math.sqrt(2.0), 1.0
    w_h1 = xavier(ks[0], n_features, n_input, g_relu)
    b_h1 = lin_bias(ks[1], n_features, n_input)
    w_r0 = xavier(ks[2], n_features, n_features, g_lin)
    b_r0 = lin_bias(ks[3], n_features, n_features)
    w_r1 = xavier(ks[4], n_features, n_features, g_lin)
    b_r1 = lin_bias(ks[5], n_features, n_features)
    w_out = xavier(ks[6], n_output, n_features, g_lin)
    b_out = lin_bias(ks[7], n_output, n_features)
    return (w_h1, b_h1, w_r0, b_r0, w_r1, b_r1, w_out, b_out)


def prepare_kernel_params(params, n_state):
    """Transpose to (in, out), split W_h1 by state/action, zero-pad to 128 lanes."""
    w_h1, b_h1, w_r0, b_r0, w_r1, b_r1, w_out, b_out = params
    F = w_r0.shape[0]
    O = w_out.shape[0]
    Fp = _round_up(F, LANE)
    Op = _round_up(O, LANE)

    def pad2(a, rows, cols):
        return jnp.pad(a, ((0, rows - a.shape[0]), (0, cols - a.shape[1])))

    w_h1_t = w_h1.T                                     # (n_input, F)
    ws = pad2(w_h1_t[:n_state], n_state, Fp)            # state rows
    wa = pad2(w_h1_t[n_state:], w_h1_t.shape[0] - n_state, Fp)
    bh = pad2(b_h1[None, :], 1, Fp)
    w0 = pad2(w_r0.T, Fp, Fp)
    b0 = pad2(b_r0[None, :], 1, Fp)
    w1 = pad2(w_r1.T, Fp, Fp)
    b1 = pad2(b_r1[None, :], 1, Fp)
    wo = pad2(w_out.T, Fp, Op)
    bo = pad2(b_out[None, :], 1, Op)
    return (ws, wa, bh, w0, b0, w1, b1, wo, bo)


def q1_reference(state, action, params):
    """Pure-JAX reference of the PyTorch Q1.forward for verification."""
    w_h1, b_h1, w_r0, b_r0, w_r1, b_r1, w_out, b_out = params
    hp = lax.Precision.HIGHEST
    x = jnp.concatenate([state.astype(jnp.float32), action.astype(jnp.float32)], axis=1)
    f1 = jax.nn.relu(jnp.dot(x, w_h1.T, precision=hp) + b_h1)
    f2 = jax.nn.relu(jnp.dot(f1, w_r0.T, precision=hp) + b_r0 + f1)
    f3 = jax.nn.relu(jnp.dot(f2, w_r1.T, precision=hp) + b_r1 + f2)
    q = jnp.dot(f3, w_out.T, precision=hp) + b_out
    return jnp.squeeze(q)


if __name__ == "__main__":
    key = jax.random.PRNGKey(0)
    k_state, k_action, k_params = jax.random.split(key, 3)

    batch, n_state, n_action = 16, 17, 6
    n_features, n_output = 128, 1

    state = jax.random.normal(k_state, (batch, n_state), jnp.float32)
    action = jax.random.normal(k_action, (batch, n_action), jnp.float32)

    torch_params = init_params(k_params, n_state, n_action, n_features, n_output)
    kernel_params = prepare_kernel_params(torch_params, n_state)

    out = q1_forward(state, action, kernel_params, n_output)
    out = jax.block_until_ready(out)

    ref = q1_reference(state, action, torch_params)
    assert out.shape == ref.shape == (batch,), (out.shape, ref.shape)
    max_err = float(jnp.max(jnp.abs(out - ref)))
    assert jnp.allclose(out, ref, atol=1e-2, rtol=1e-2), max_err

    print("KERNEL_OK")
</pallas_src>

<mosaic_0001>
module attributes {stable_mosaic.version = 11 : i64} {
  func.func @q1_kernel(%arg0: i32, %arg1: memref<16x17xf32, #tpu.memory_space<vmem>>, %arg2: memref<16x6xf32, #tpu.memory_space<vmem>>, %arg3: memref<17x128xf32, #tpu.memory_space<vmem>>, %arg4: memref<6x128xf32, #tpu.memory_space<vmem>>, %arg5: memref<1x128xf32, #tpu.memory_space<vmem>>, %arg6: memref<128x128xf32, #tpu.memory_space<vmem>>, %arg7: memref<1x128xf32, #tpu.memory_space<vmem>>, %arg8: memref<128x128xf32, #tpu.memory_space<vmem>>, %arg9: memref<1x128xf32, #tpu.memory_space<vmem>>, %arg10: memref<128x128xf32, #tpu.memory_space<vmem>>, %arg11: memref<1x128xf32, #tpu.memory_space<vmem>>, %arg12: memref<16x128xf32, #tpu.memory_space<vmem>>) attributes {dimension_semantics = [#tpu.dimension_semantics<parallel>], iteration_bounds = array<i64: 1>, scalar_prefetch = 0 : i64, scratch_operands = 0 : i64, tpu.core_type = #tpu.core_type<tc>, window_params = [{transform_indices = @transform_0, window_bounds = array<i64: 16, 17>}, {transform_indices = @transform_1, window_bounds = array<i64: 16, 6>}, {pipeline_mode = #tpu.pipeline_mode<synchronous>, transform_indices = @transform_2, window_bounds = array<i64: 17, 128>}, {pipeline_mode = #tpu.pipeline_mode<synchronous>, transform_indices = @transform_3, window_bounds = array<i64: 6, 128>}, {pipeline_mode = #tpu.pipeline_mode<synchronous>, transform_indices = @transform_4, window_bounds = array<i64: 1, 128>}, {pipeline_mode = #tpu.pipeline_mode<synchronous>, transform_indices = @transform_5, window_bounds = array<i64: 128, 128>}, {pipeline_mode = #tpu.pipeline_mode<synchronous>, transform_indices = @transform_6, window_bounds = array<i64: 1, 128>}, {pipeline_mode = #tpu.pipeline_mode<synchronous>, transform_indices = @transform_7, window_bounds = array<i64: 128, 128>}, {pipeline_mode = #tpu.pipeline_mode<synchronous>, transform_indices = @transform_8, window_bounds = array<i64: 1, 128>}, {pipeline_mode = #tpu.pipeline_mode<synchronous>, transform_indices = @transform_9, window_bounds = array<i64: 128, 128>}, {pipeline_mode = #tpu.pipeline_mode<synchronous>, transform_indices = @transform_10, window_bounds = array<i64: 1, 128>}, {transform_indices = @transform_11, window_bounds = array<i64: 16, 128>}]} {
    %c0 = arith.constant 0 : index
    %c0_0 = arith.constant 0 : index
    %0 = vector.load %arg1[%c0, %c0_0] : memref<16x17xf32, #tpu.memory_space<vmem>>, vector<16x17xf32>
    %c0_1 = arith.constant 0 : index
    %c0_2 = arith.constant 0 : index
    %1 = vector.load %arg2[%c0_1, %c0_2] : memref<16x6xf32, #tpu.memory_space<vmem>>, vector<16x6xf32>
    %c0_3 = arith.constant 0 : index
    %c0_4 = arith.constant 0 : index
    %2 = vector.load %arg3[%c0_3, %c0_4] : memref<17x128xf32, #tpu.memory_space<vmem>>, vector<17x128xf32>
    %cst = arith.constant dense<0.000000e+00> : vector<16x128xf32>
    %3 = tpu.matmul %0, %2, %cst {dimension_numbers = #tpu.dot_dimension_numbers<[1], [0], [0], [1], [0, 0, 1, 1], [], []>} : vector<16x17xf32>, vector<17x128xf32>, vector<16x128xf32> -> vector<16x128xf32>
    %c0_5 = arith.constant 0 : index
    %c0_6 = arith.constant 0 : index
    %4 = vector.load %arg4[%c0_5, %c0_6] : memref<6x128xf32, #tpu.memory_space<vmem>>, vector<6x128xf32>
    %cst_7 = arith.constant dense<0.000000e+00> : vector<16x128xf32>
    %5 = tpu.matmul %1, %4, %cst_7 {dimension_numbers = #tpu.dot_dimension_numbers<[1], [0], [0], [1], [0, 0, 1, 1], [], []>} : vector<16x6xf32>, vector<6x128xf32>, vector<16x128xf32> -> vector<16x128xf32>
    %6 = arith.addf %3, %5 : vector<16x128xf32>
    %c0_8 = arith.constant 0 : index
    %c0_9 = arith.constant 0 : index
    %7 = vector.load %arg5[%c0_8, %c0_9] : memref<1x128xf32, #tpu.memory_space<vmem>>, vector<1x128xf32>
    %8 = vector.broadcast %7 : vector<1x128xf32> to vector<16x128xf32>
    %9 = arith.addf %6, %8 : vector<16x128xf32>
    %cst_10 = arith.constant 0.000000e+00 : f32
    %10 = vector.broadcast %cst_10 : f32 to vector<16x128xf32>
    %11 = arith.maximumf %9, %10 : vector<16x128xf32>
    %c0_11 = arith.constant 0 : index
    %c0_12 = arith.constant 0 : index
    %12 = vector.load %arg6[%c0_11, %c0_12] : memref<128x128xf32, #tpu.memory_space<vmem>>, vector<128x128xf32>
    %cst_13 = arith.constant dense<0.000000e+00> : vector<16x128xf32>
    %13 = tpu.matmul %11, %12, %cst_13 {dimension_numbers = #tpu.dot_dimension_numbers<[1], [0], [0], [1], [0, 0, 1, 1], [], []>} : vector<16x128xf32>, vector<128x128xf32>, vector<16x128xf32> -> vector<16x128xf32>
    %c0_14 = arith.constant 0 : index
    %c0_15 = arith.constant 0 : index
    %14 = vector.load %arg7[%c0_14, %c0_15] : memref<1x128xf32, #tpu.memory_space<vmem>>, vector<1x128xf32>
    %15 = vector.broadcast %14 : vector<1x128xf32> to vector<16x128xf32>
    %16 = arith.addf %13, %15 : vector<16x128xf32>
    %17 = arith.addf %16, %11 : vector<16x128xf32>
    %cst_16 = arith.constant 0.000000e+00 : f32
    %18 = vector.broadcast %cst_16 : f32 to vector<16x128xf32>
    %19 = arith.maximumf %17, %18 : vector<16x128xf32>
    %c0_17 = arith.constant 0 : index
    %c0_18 = arith.constant 0 : index
    %20 = vector.load %arg8[%c0_17, %c0_18] : memref<128x128xf32, #tpu.memory_space<vmem>>, vector<128x128xf32>
    %cst_19 = arith.constant dense<0.000000e+00> : vector<16x128xf32>
    %21 = tpu.matmul %19, %20, %cst_19 {dimension_numbers = #tpu.dot_dimension_numbers<[1], [0], [0], [1], [0, 0, 1, 1], [], []>} : vector<16x128xf32>, vector<128x128xf32>, vector<16x128xf32> -> vector<16x128xf32>
    %c0_20 = arith.constant 0 : index
    %c0_21 = arith.constant 0 : index
    %22 = vector.load %arg9[%c0_20, %c0_21] : memref<1x128xf32, #tpu.memory_space<vmem>>, vector<1x128xf32>
    %23 = vector.broadcast %22 : vector<1x128xf32> to vector<16x128xf32>
    %24 = arith.addf %21, %23 : vector<16x128xf32>
    %25 = arith.addf %24, %19 : vector<16x128xf32>
    %cst_22 = arith.constant 0.000000e+00 : f32
    %26 = vector.broadcast %cst_22 : f32 to vector<16x128xf32>
    %27 = arith.maximumf %25, %26 : vector<16x128xf32>
    %c0_23 = arith.constant 0 : index
    %c0_24 = arith.constant 0 : index
    %28 = vector.load %arg10[%c0_23, %c0_24] : memref<128x128xf32, #tpu.memory_space<vmem>>, vector<128x128xf32>
    %cst_25 = arith.constant dense<0.000000e+00> : vector<16x128xf32>
    %29 = tpu.matmul %27, %28, %cst_25 {dimension_numbers = #tpu.dot_dimension_numbers<[1], [0], [0], [1], [0, 0, 1, 1], [], []>} : vector<16x128xf32>, vector<128x128xf32>, vector<16x128xf32> -> vector<16x128xf32>
    %c0_26 = arith.constant 0 : index
    %c0_27 = arith.constant 0 : index
    %30 = vector.load %arg11[%c0_26, %c0_27] : memref<1x128xf32, #tpu.memory_space<vmem>>, vector<1x128xf32>
    %31 = vector.broadcast %30 : vector<1x128xf32> to vector<16x128xf32>
    %32 = arith.addf %29, %31 : vector<16x128xf32>
    %c0_28 = arith.constant 0 : index
    %c0_29 = arith.constant 0 : index
    %33 = vector.load %arg12[%c0_28, %c0_29] : memref<16x128xf32, #tpu.memory_space<vmem>>, vector<16x128xf32>
    tpu.vector_store %arg12[%c0_28, %c0_29], %32 {strides = array<i32>} : memref<16x128xf32, #tpu.memory_space<vmem>>, vector<16x128xf32>,
    return
  }
  func.func @transform_0(%arg0: i32) -> (i32, i32) {
    %c0_i32 = arith.constant 0 : i32
    %c0_i32_0 = arith.constant 0 : i32
    return %arg0, %c0_i32 : i32, i32
  }
  func.func @transform_1(%arg0: i32) -> (i32, i32) {
    %c0_i32 = arith.constant 0 : i32
    %c0_i32_0 = arith.constant 0 : i32
    return %arg0, %c0_i32 : i32, i32
  }
  func.func @transform_2(%arg0: i32) -> (i32, i32) {
    %c0_i32 = arith.constant 0 : i32
    %c0_i32_0 = arith.constant 0 : i32
    %c0_i32_1 = arith.constant 0 : i32
    return %c0_i32, %c0_i32_0 : i32, i32
  }
  func.func @transform_3(%arg0: i32) -> (i32, i32) {
    %c0_i32 = arith.constant 0 : i32
    %c0_i32_0 = arith.constant 0 : i32
    %c0_i32_1 = arith.constant 0 : i32
    return %c0_i32, %c0_i32_0 : i32, i32
  }
  func.func @transform_4(%arg0: i32) -> (i32, i32) {
    %c0_i32 = arith.constant 0 : i32
    %c0_i32_0 = arith.constant 0 : i32
    %c0_i32_1 = arith.constant 0 : i32
    return %c0_i32, %c0_i32_0 : i32, i32
  }
  func.func @transform_5(%arg0: i32) -> (i32, i32) {
    %c0_i32 = arith.constant 0 : i32
    %c0_i32_0 = arith.constant 0 : i32
    %c0_i32_1 = arith.constant 0 : i32
    return %c0_i32, %c0_i32_0 : i32, i32
  }
  func.func @transform_6(%arg0: i32) -> (i32, i32) {
    %c0_i32 = arith.constant 0 : i32
    %c0_i32_0 = arith.constant 0 : i32
    %c0_i32_1 = arith.constant 0 : i32
    return %c0_i32, %c0_i32_0 : i32, i32
  }
  func.func @transform_7(%arg0: i32) -> (i32, i32) {
    %c0_i32 = arith.constant 0 : i32
    %c0_i32_0 = arith.constant 0 : i32
    %c0_i32_1 = arith.constant 0 : i32
    return %c0_i32, %c0_i32_0 : i32, i32
  }
  func.func @transform_8(%arg0: i32) -> (i32, i32) {
    %c0_i32 = arith.constant 0 : i32
    %c0_i32_0 = arith.constant 0 : i32
    %c0_i32_1 = arith.constant 0 : i32
    return %c0_i32, %c0_i32_0 : i32, i32
  }
  func.func @transform_9(%arg0: i32) -> (i32, i32) {
    %c0_i32 = arith.constant 0 : i32
    %c0_i32_0 = arith.constant 0 : i32
    %c0_i32_1 = arith.constant 0 : i32
    return %c0_i32, %c0_i32_0 : i32, i32
  }
  func.func @transform_10(%arg0: i32) -> (i32, i32) {
    %c0_i32 = arith.constant 0 : i32
    %c0_i32_0 = arith.constant 0 : i32
    %c0_i32_1 = arith.constant 0 : i32
    return %c0_i32, %c0_i32_0 : i32, i32
  }
  func.func @transform_11(%arg0: i32) -> (i32, i32) {
    %c0_i32 = arith.constant 0 : i32
    %c0_i32_0 = arith.constant 0 : i32
    return %arg0, %c0_i32 : i32, i32
  }
}

</mosaic_0001>

<bundles_post_ra>
// kernel: tpu_custom_call.1
= control target key start
LH: loop header
LB: loop body
LE: loop exit
PB: predicated region body
PF: predicated region fallthrough
CT: control target
= control target key end

     0   :  { %16 = vsyncpa [#allocation3], 0  ;;  %s1537_s0 = inlined_call_operand.hbm [shape: f32[16,17], index: 0, kind: input, shape index: {}]   ;;  %s1538_s1 = inlined_call_operand.hbm [shape: f32[16,6], index: 1, kind: input, shape index: {}]   ;;  %s1539_s2 = inlined_call_operand.hbm [shape: f32[17,128], index: 2, kind: input, shape index: {}]   ;;  %s1540_s3 = inlined_call_operand.hbm [shape: f32[6,128], index: 3, kind: input, shape index: {}]   ;;  %s1541_s4 = inlined_call_operand.hbm [shape: f32[1,128], index: 4, kind: input, shape index: {}]   ;;  %s1542_s5 = inlined_call_operand.hbm [shape: f32[128,128], index: 5, kind: input, shape index: {}]   ;;  %s1543_s6 = inlined_call_operand.hbm [shape: f32[1,128], index: 6, kind: input, shape index: {}]   ;;  %s1544_s7 = inlined_call_operand.hbm [shape: f32[128,128], index: 7, kind: input, shape index: {}]   ;;  %s1545_s8 = inlined_call_operand.hbm [shape: f32[1,128], index: 8, kind: input, shape index: {}]   ;;  %s1546_s9 = inlined_call_operand.hbm [shape: f32[128,128], index: 9, kind: input, shape index: {}]   ;;  %s1547_s10 = inlined_call_operand.hbm [shape: f32[1,128], index: 10, kind: input, shape index: {}]   ;;  %s1548_s11 = inlined_call_operand.hbm [shape: f32[16,128], index: 11, kind: output, shape index: {}]  }
   0x1   :  { %17 = vsyncpa [#allocation6], 0 }
   0x2   :  { %18 = vsyncpa [#allocation9], 0 }
   0x3   :  { %19 = vsyncpa [#allocation12], 0 }
   0x4   :  { %20 = vsyncpa [#allocation15], 0 }
   0x5   :  { %21 = vsyncpa [#allocation18], 0 }
   0x6   :  { %22 = vsyncpa [#allocation4], 0  ;;  %s1280_s17 = smov [#allocation5]   ;;  %s1281_s19 = smov [#allocation8]  }
   0x7   :  { %s40_s18 = sshll.u32 %s1280_s17, 4  ;;  %s65_s20 = sshll.u32 %s1281_s19, 4  ;;  %s41_s18 = int_to_ptr.vmem [resolvable:$true] %s40_s18  ;;  %s66_s20 = int_to_ptr.vmem [resolvable:$true] %s65_s20 }
   0x8   :  { %s1002_s23 = scalar_lea.hbm %s1538_s1, 256 }
   0x9   :  { %p1003_p0 = scmp.ne.s32.totalorder %s1538_s1, %s1002_s23  ;;  %p1006_p1 = scmp.lt.u32.totalorder %s1002_s23, %s1538_s1 }
   0xb   :  { %p1008_p2 = pnand %p1006_p1, %p1003_p0 }
   0xd   :  { %1011 = shalt.err (!%p1008_p2)
}
   0xe   :  { %s1012_s28 = scalar_lea.vmem %s41_s18, 256  ;;  %p1017_p4 = scmp.lt.s32.totalorder %s41_s18, %s41_s18 }
   0xf   :  { %p1013_p3 = scmp.ne.s32.totalorder %s41_s18, %s1012_s28  ;;  %p1018_p5 = scmp.lt.s32.totalorder %s1012_s28, %s1012_s28 }
  0x11   :  { %p1019_p6 = por %p1018_p5, %p1017_p4 }
  0x13   :  { %p1020_p7 = pnand %p1019_p6, %p1013_p3 }
  0x15   :  { %1023 = shalt.err (!%p1020_p7)
}
  0x16   :  { %s1282_s29 = smov 128   ;;  %s1283_s30 = smov 8  }
  0x17   :  { %46 = dma.hbm_to_vmem [thread:$0]  %s1538_s1, 256, %s41_s18, [#allocation6], %s1282_s29, %s1282_s29, %s1283_s30  }
  0x18   :  { %s1024_s16 = scalar_lea.hbm %s1540_s3, 128 }
  0x19   :  { %p1025_p8 = scmp.ne.s32.totalorder %s1540_s3, %s1024_s16  ;;  %p1028_p9 = scmp.lt.u32.totalorder %s1024_s16, %s1540_s3 }
  0x1b   :  { %p1030_p10 = pnand %p1028_p9, %p1025_p8 }
  0x1d   :  { %1033 = shalt.err (!%p1030_p10)
}
  0x1e   :  { %s1034_s23 = scalar_lea.vmem %s66_s20, 128  ;;  %p1039_p12 = scmp.lt.s32.totalorder %s66_s20, %s66_s20 }
  0x1f   :  { %p1035_p11 = scmp.ne.s32.totalorder %s66_s20, %s1034_s23  ;;  %p1040_p13 = scmp.lt.s32.totalorder %s1034_s23, %s1034_s23 }
  0x21   :  { %p1041_p0 = por %p1040_p13, %p1039_p12 }
  0x23   :  { %p1042_p1 = pnand %p1041_p0, %p1035_p11 }
  0x25   :  { %1045 = shalt.err (!%p1042_p1)
}
  0x26   :  { %68 = dma.hbm_to_vmem [thread:$0]  %s1540_s3, 128, %s66_s20, [#allocation9]  }
  0x27   :  { %s1284_s24 = smov [#allocation11]   ;;  %s1285_s26 = smov [#allocation14]  }
  0x28   :  { %s84_s25 = sshll.u32 %s1284_s24, 4  ;;  %s106_s27 = sshll.u32 %s1285_s26, 4  ;;  %s85_s25 = int_to_ptr.vmem [resolvable:$true] %s84_s25  ;;  %s1381_s27 = int_to_ptr.vmem [resolvable:$true] %s106_s27 }
  0x29   :  { %s1046_s13 = scalar_lea.hbm %s1542_s5, 2048 }
  0x2a   :  { %p1047_p2 = scmp.ne.s32.totalorder %s1542_s5, %s1046_s13  ;;  %p1050_p3 = scmp.lt.u32.totalorder %s1046_s13, %s1542_s5 }
  0x2c   :  { %p1052_p4 = pnand %p1050_p3, %p1047_p2 }
  0x2e   :  { %1055 = shalt.err (!%p1052_p4)
}
  0x2f   :  { %s1056_s3 = scalar_lea.vmem %s85_s25, 2048  ;;  %p1061_p6 = scmp.lt.s32.totalorder %s85_s25, %s85_s25 }
  0x30   :  { %p1057_p5 = scmp.ne.s32.totalorder %s85_s25, %s1056_s3  ;;  %p1062_p7 = scmp.lt.s32.totalorder %s1056_s3, %s1056_s3 }
  0x32   :  { %p1063_p8 = por %p1062_p7, %p1061_p6 }
  0x34   :  { %p1064_p9 = pnand %p1063_p8, %p1057_p5 }
  0x36   :  { %1067 = shalt.err (!%p1064_p9)
}
  0x37   :  { %90 = dma.hbm_to_vmem [thread:$0]  %s1542_s5, 2048, %s85_s25, [#allocation12], %s1282_s29, %s1282_s29, %s1283_s30  }
  0x38   :  { %s1068_s23 = scalar_lea.hbm %s1544_s7, 2048 }
  0x39   :  { %p1069_p10 = scmp.ne.s32.totalorder %s1544_s7, %s1068_s23  ;;  %p1072_p11 = scmp.lt.u32.totalorder %s1068_s23, %s1544_s7 }
  0x3b   :  { %p1074_p12 = pnand %p1072_p11, %p1069_p10 }
  0x3d   :  { %1077 = shalt.err (!%p1074_p12)
}
  0x3e   :  { %s1078_s28 = scalar_lea.vmem %s1381_s27, 2048  ;;  %p1083_p0 = scmp.lt.s32.totalorder %s1381_s27, %s1381_s27 }
  0x3f   :  { %p1079_p13 = scmp.ne.s32.totalorder %s1381_s27, %s1078_s28  ;;  %p1084_p1 = scmp.lt.s32.totalorder %s1078_s28, %s1078_s28 }
  0x41   :  { %p1085_p2 = por %p1084_p1, %p1083_p0 }
  0x43   :  { %p1086_p3 = pnand %p1085_p2, %p1079_p13 }
  0x45   :  { %1089 = shalt.err (!%p1086_p3)
}
  0x46   :  { %112 = dma.hbm_to_vmem [thread:$0]  %s1544_s7, 2048, %s1381_s27, [#allocation15], %s1282_s29, %s1282_s29, %s1283_s30  }
  0x47   :  { %s1286_s12 = smov [#allocation17]   ;;  %s1287_s14 = smov [#allocation2]  }
  0x48   :  { %s128_s13 = sshll.u32 %s1286_s12, 4  ;;  %s28_s15 = sshll.u32 %s1287_s14, 4  ;;  %s129_s13 = int_to_ptr.vmem [resolvable:$true] %s128_s13  ;;  %s1418_s15 = int_to_ptr.vmem [resolvable:$true] %s28_s15 }
  0x49   :  { %s1090_s3 = scalar_lea.hbm %s1546_s9, 2048 }
  0x4a   :  { %p1091_p4 = scmp.ne.s32.totalorder %s1546_s9, %s1090_s3  ;;  %p1094_p5 = scmp.lt.u32.totalorder %s1090_s3, %s1546_s9 }
  0x4c   :  { %p1096_p6 = pnand %p1094_p5, %p1091_p4 }
  0x4e   :  { %1099 = shalt.err (!%p1096_p6)
}
  0x4f   :  { %s1100_s7 = scalar_lea.vmem %s129_s13, 2048  ;;  %p1105_p8 = scmp.lt.s32.totalorder %s129_s13, %s129_s13 }
  0x50   :  { %p1101_p7 = scmp.ne.s32.totalorder %s129_s13, %s1100_s7  ;;  %p1106_p9 = scmp.lt.s32.totalorder %s1100_s7, %s1100_s7 }
  0x52   :  { %p1107_p10 = por %p1106_p9, %p1105_p8 }
  0x54   :  { %p1108_p11 = pnand %p1107_p10, %p1101_p7 }
  0x56   :  { %1111 = shalt.err (!%p1108_p11)
}
  0x57   :  { %134 = dma.hbm_to_vmem [thread:$0]  %s1546_s9, 2048, %s129_s13, [#allocation18], %s1282_s29, %s1282_s29, %s1283_s30  }
  0x58   :  { %s1112_s24 = scalar_lea.hbm %s1537_s0, 256 }
  0x59   :  { %p1113_p12 = scmp.ne.s32.totalorder %s1537_s0, %s1112_s24  ;;  %p1116_p13 = scmp.lt.u32.totalorder %s1112_s24, %s1537_s0 }
  0x5b   :  { %p1118_p0 = pnand %p1116_p13, %p1113_p12 }
  0x5d   :  { %1121 = shalt.err (!%p1118_p0)
}
  0x5e   :  { %s1122_s12 = scalar_lea.vmem %s1418_s15, 256  ;;  %p1127_p2 = scmp.lt.s32.totalorder %s1418_s15, %s1418_s15 }
  0x5f   :  { %p1123_p1 = scmp.ne.s32.totalorder %s1418_s15, %s1122_s12  ;;  %p1128_p3 = scmp.lt.s32.totalorder %s1122_s12, %s1122_s12 }
  0x61   :  { %p1129_p4 = por %p1128_p3, %p1127_p2 }
  0x63   :  { %p1130_p5 = pnand %p1129_p4, %p1123_p1 }
  0x65   :  { %1133 = shalt.err (!%p1130_p5)
}
  0x66   :  { %34 = dma.hbm_to_vmem [thread:$0]  %s1537_s0, 256, %s1418_s15, [#allocation3], %s1282_s29, %s1282_s29, %s1283_s30  }
  0x67   :  { %s1288_s14 = smov [#allocation7]   ;;  %s1289_s17 = smov [#allocation10]  }
  0x68   :  { %s52_s16 = sshll.u32 %s1288_s14, 4  ;;  %s75_s3 = sshll.u32 %s1289_s17, 4  ;;  %s53_s16 = int_to_ptr.vmem [resolvable:$true] %s52_s16  ;;  %s76_s3 = int_to_ptr.vmem [resolvable:$true] %s75_s3 }
  0x69   :  { %s1134_s21 = scalar_lea.hbm %s1539_s2, 384 }
  0x6a   :  { %p1135_p6 = scmp.ne.s32.totalorder %s1539_s2, %s1134_s21  ;;  %p1138_p7 = scmp.lt.u32.totalorder %s1134_s21, %s1539_s2 }
  0x6c   :  { %p1140_p8 = pnand %p1138_p7, %p1135_p6 }
  0x6e   :  { %1143 = shalt.err (!%p1140_p8)
}
  0x6f   :  { %s1144_s0 = scalar_lea.vmem %s53_s16, 384  ;;  %p1149_p10 = scmp.lt.s32.totalorder %s53_s16, %s53_s16 }
  0x70   :  { %p1145_p9 = scmp.ne.s32.totalorder %s53_s16, %s1144_s0  ;;  %p1150_p11 = scmp.lt.s32.totalorder %s1144_s0, %s1144_s0 }
  0x72   :  { %p1151_p12 = por %p1150_p11, %p1149_p10 }
  0x74   :  { %p1152_p13 = pnand %p1151_p12, %p1145_p9 }
  0x76   :  { %1155 = shalt.err (!%p1152_p13)
}
  0x77   :  { %58 = dma.hbm_to_vmem [thread:$0]  %s1539_s2, 384, %s53_s16, [#allocation6], %s1282_s29, %s1282_s29, %s1283_s30  }
  0x78   :  { %s1156_s26 = scalar_lea.hbm %s1541_s4, 16 }
  0x79   :  { %p1157_p0 = scmp.ne.s32.totalorder %s1541_s4, %s1156_s26  ;;  %p1160_p1 = scmp.lt.u32.totalorder %s1156_s26, %s1541_s4 }
  0x7b   :  { %p1162_p2 = pnand %p1160_p1, %p1157_p0 }
  0x7d   :  { %1165 = shalt.err (!%p1162_p2)
}
  0x7e   :  { %s1166_s9 = scalar_lea.vmem %s76_s3, 16  ;;  %s1170_s13 = scalar_lea.vmem %s76_s3, 32 }
  0x7f   :  { %p1167_p3 = scmp.ne.s32.totalorder %s76_s3, %s1166_s9  ;;  %p1171_p4 = scmp.lt.s32.totalorder %s76_s3, %s76_s3 }
  0x80   :  { %p1172_p5 = scmp.lt.s32.totalorder %s1170_s13, %s1166_s9 }
  0x82   :  { %p1173_p6 = por %p1172_p5, %p1171_p4 }
  0x84   :  { %p1174_p7 = pnand %p1173_p6, %p1167_p3 }
  0x86   :  { %1177 = shalt.err (!%p1174_p7)
}
  0x87   :  { %78 = dma.hbm_to_vmem [thread:$0]  %s1541_s4, 16, %s76_s3, [#allocation9]  }
  0x88   :  { %s1290_s16 = smov [#allocation13]   ;;  %s1291_s20 = smov [#allocation16]  }
  0x89   :  { %s97_s17 = sshll.u32 %s1290_s16, 4  ;;  %s119_s19 = sshll.u32 %s1291_s20, 4  ;;  %s98_s17 = int_to_ptr.vmem [resolvable:$true] %s97_s17  ;;  %s120_s19 = int_to_ptr.vmem [resolvable:$true] %s119_s19 }
  0x8a   :  { %s1178_s7 = scalar_lea.hbm %s1543_s6, 16 }
  0x8b   :  { %p1179_p8 = scmp.ne.s32.totalorder %s1543_s6, %s1178_s7  ;;  %p1182_p9 = scmp.lt.u32.totalorder %s1178_s7, %s1543_s6 }
  0x8d   :  { %p1184_p10 = pnand %p1182_p9, %p1179_p8 }
  0x8f   :  { %1187 = shalt.err (!%p1184_p10)
}
  0x90   :  { %s1188_s4 = scalar_lea.vmem %s98_s17, 16  ;;  %s1192_s3 = scalar_lea.vmem %s98_s17, 32 }
  0x91   :  { %p1189_p11 = scmp.ne.s32.totalorder %s98_s17, %s1188_s4  ;;  %p1193_p12 = scmp.lt.s32.totalorder %s98_s17, %s98_s17 }
  0x92   :  { %p1194_p13 = scmp.lt.s32.totalorder %s1192_s3, %s1188_s4 }
  0x94   :  { %p1195_p0 = por %p1194_p13, %p1193_p12 }
  0x96   :  { %p1196_p1 = pnand %p1195_p0, %p1189_p11 }
  0x98   :  { %1199 = shalt.err (!%p1196_p1)
}
  0x99   :  { %100 = dma.hbm_to_vmem [thread:$0]  %s1543_s6, 16, %s98_s17, [#allocation12]  }
  0x9a   :  { %s1200_s28 = scalar_lea.hbm %s1545_s8, 16 }
  0x9b   :  { %p1201_p2 = scmp.ne.s32.totalorder %s1545_s8, %s1200_s28  ;;  %p1204_p3 = scmp.lt.u32.totalorder %s1200_s28, %s1545_s8 }
  0x9d   :  { %p1206_p4 = pnand %p1204_p3, %p1201_p2 }
  0x9f   :  { %1209 = shalt.err (!%p1206_p4)
}
  0xa0   :  { %s1210_s13 = scalar_lea.vmem %s120_s19, 16  ;;  %s1214_s2 = scalar_lea.vmem %s120_s19, 32 }
  0xa1   :  { %p1211_p5 = scmp.ne.s32.totalorder %s120_s19, %s1210_s13  ;;  %p1215_p6 = scmp.lt.s32.totalorder %s120_s19, %s120_s19 }
  0xa2   :  { %p1216_p7 = scmp.lt.s32.totalorder %s1214_s2, %s1210_s13 }
  0xa4   :  { %p1217_p8 = por %p1216_p7, %p1215_p6 }
  0xa6   :  { %p1218_p9 = pnand %p1217_p8, %p1211_p5 }
  0xa8   :  { %1221 = shalt.err (!%p1218_p9)
}
  0xa9   :  { %122 = dma.hbm_to_vmem [thread:$0]  %s1545_s8, 16, %s120_s19, [#allocation15]  }
  0xaa   :  { %s1292_s16 = smov [#allocation19]   ;;  %s1222_s22 = scalar_lea.hbm %s1547_s10, 16 }
  0xab   :  { %s141_s17 = sshll.u32 %s1292_s16, 4  ;;  %p1223_p10 = scmp.ne.s32.totalorder %s1547_s10, %s1222_s22  ;;  %s142_s17 = int_to_ptr.vmem [resolvable:$true] %s141_s17 }
  0xac   :  { %p1226_p11 = scmp.lt.u32.totalorder %s1222_s22, %s1547_s10 }
  0xae   :  { %p1228_p12 = pnand %p1226_p11, %p1223_p10 }
  0xb0   :  { %1231 = shalt.err (!%p1228_p12)
}
  0xb1   :  { %s1232_s15 = scalar_lea.vmem %s142_s17, 16  ;;  %s1236_s8 = scalar_lea.vmem %s142_s17, 32 }
  0xb2   :  { %p1233_p13 = scmp.ne.s32.totalorder %s142_s17, %s1232_s15  ;;  %p1237_p0 = scmp.lt.s32.totalorder %s142_s17, %s142_s17 }
  0xb3   :  { %p1238_p1 = scmp.lt.s32.totalorder %s1236_s8, %s1232_s15 }
  0xb5   :  { %p1239_p2 = por %p1238_p1, %p1237_p0 }
  0xb7   :  { %p1240_p3 = pnand %p1239_p2, %p1233_p13 }
  0xb9   :  { %1243 = shalt.err (!%p1240_p3)
}
  0xba   :  { %144 = dma.hbm_to_vmem [thread:$0]  %s1547_s10, 16, %s142_s17, [#allocation18]  }
  0xbb   :  { %1266 = dma.done.wait [#allocation3], 256  }
  0xbc   :  { %1267 = vsyncadd [#allocation3], 4294967040 }
  0xbd   :  { %1268 = dma.done.wait [#allocation6], 640  }
  0xbe   :  { %1269 = vsyncadd [#allocation6], 4294966656 }
  0xbf   :  { %1270 = dma.done.wait [#allocation9], 144  }
  0xc0   :  { %1271 = vsyncadd [#allocation9], 4294967152 }
  0xc1   :  { %1272 = dma.done.wait [#allocation12], 2064  }
  0xc2   :  { %1273 = vsyncadd [#allocation12], 4294965232 }
  0xc3   :  { %1274 = dma.done.wait [#allocation15], 2064  }
  0xc4   :  { %1275 = vsyncadd [#allocation15], 4294965232 }
  0xc5   :  { %1276 = dma.done.wait [#allocation18], 2064  }
  0xc6   :  { %1277 = vsyncadd [#allocation18], 4294965232  ;;  %vm193_vm0 = vcmask 1045504   ;;  %vm186_vm1 = vcmask 48128   ;;  %v185_v0 = vld [vmem:[#allocation8] sm:$0x3f] }
  0xc7   :  { %v180_v1 = vld [vmem:[#allocation5] sm:$0xff]  ;;  %v181_v2 = vld [vmem:[#allocation5 + $0x8] sm:$0xff]  ;;  %767 = vmatprep.subr.msk.mxu0 %vm193_vm0, %v185_v0  ;;  %v182_v3 = vld [vmem:[#allocation7] sm:$0xff]  ;;  %vm272_vm2 = vcmask 138240   ;;  %vm279_vm3 = vcmask 1040384   ;;  %s1293_s10 = smov [#allocation20]  }
  0xc8   :  { %769 = vmatprep.mubr.msk.f32.mxu0 %vm186_vm1, %v180_v1  ;;  %v183_v4 = vld [vmem:[#allocation7 + $0x8] sm:$0xff]  ;;  %768 = vmatpush3.msk.msra.mxu0 %vm193_vm0, %v185_v0  ;;  %v184_v6 = vld [vmem:[#allocation7 + $0x10] sm:$0x1]  ;;  %v178_v7 = vld [vmem:[#allocation2] sm:$0xff]  ;;  %s678_s3 = sshll.u32 %s1293_s10, 4  ;;  %s679_s3 = int_to_ptr.vmem [resolvable:$true] %s678_s3 }
  0xc9   :  { %v886_v5 = vpack.c.bf16 %v183_v4, %v182_v3  ;;  %v369_v8 = vld [vmem:[#allocation11] sm:$0xff]  ;;  %770 = vmatmul.mubr.msk.f32.vlgmr.msra.gmra.mrb[0].mxu0 %vm186_vm1, %v181_v2  ;;  %v370_v9 = vld [vmem:[#allocation11 + $0x8] sm:$0xff]  ;;  %v371_v10 = vld [vmem:[#allocation11 + $0x10] sm:$0xff]  ;;  %s1244_s1 = scalar_lea.vmem %s679_s3, 256  ;;  %p1249_p5 = scmp.lt.s32.totalorder %s679_s3, %s679_s3 }
  0xca   :  { %v372_v11 = vld [vmem:[#allocation11 + $0x18] sm:$0xff]  ;;  %778 = vmatprep.mubr.msk.f32.mxu0 %vm272_vm2, %v178_v7  ;;  %v890_v12 = vpack.c.bf16 %v370_v9, %v369_v8  ;;  %v373_v14 = vld [vmem:[#allocation11 + $0x20] sm:$0xff]  ;;  %v374_v15 = vld [vmem:[#allocation11 + $0x28] sm:$0xff]  ;;  %p1245_p4 = scmp.ne.s32.totalorder %s679_s3, %s1244_s1  ;;  %p1250_p6 = scmp.lt.s32.totalorder %s1244_s1, %s1244_s1 }
  0xcb   :  { %887 = vmatprep.subr.bf16.mxu0 %v886_v5  ;;  %v894_v13 = vpack.c.bf16 %v372_v11, %v371_v10  ;;  %v179_v16 = vld [vmem:[#allocation2 + $0x8] sm:$0xff]  ;;  %v898_v17 = vpack.c.bf16 %v374_v15, %v373_v14  ;;  %v375_v18 = vld [vmem:[#allocation11 + $0x30] sm:$0xff]  ;;  %v376_v19 = vld [vmem:[#allocation11 + $0x38] sm:$0xff] }
  0xcc   :  { %889 = vmatpush3.bf16.msra.mxu0 %v886_v5  ;;  %891 = vmatprep.subr.bf16.mxu1 %v890_v12  ;;  %v902_v20 = vpack.c.bf16 %v376_v19, %v375_v18  ;;  %v377_v21 = vld [vmem:[#allocation11 + $0x40] sm:$0xff]  ;;  %v378_v22 = vld [vmem:[#allocation11 + $0x48] sm:$0xff]  ;;  %v379_v24 = vld [vmem:[#allocation11 + $0x50] sm:$0xff]  ;;  %p1251_p7 = por %p1250_p6, %p1249_p5 }
  0xcd   :  { %776 = vmatprep.subr.msk.mxu0 %vm279_vm3, %v184_v6  ;;  %893 = vmatpush3.bf16.msra.mxu1 %v890_v12  ;;  %v906_v23 = vpack.c.bf16 %v378_v22, %v377_v21  ;;  %v380_v25 = vld [vmem:[#allocation11 + $0x58] sm:$0xff]  ;;  %v381_v27 = vld [vmem:[#allocation11 + $0x60] sm:$0xff]  ;;  %v382_v28 = vld [vmem:[#allocation11 + $0x68] sm:$0xff] }
  0xce   :  { %895 = vmatprep.subr.bf16.mxu1 %v894_v13  ;;  %v910_v26 = vpack.c.bf16 %v380_v25, %v379_v24  ;;  %v914_v29 = vpack.c.bf16 %v382_v28, %v381_v27  ;;  %v383_v30 = vld [vmem:[#allocation11 + $0x70] sm:$0xff]  ;;  %v384_v31 = vld [vmem:[#allocation11 + $0x78] sm:$0xff]  ;;  %v471_v33 = vld [vmem:[#allocation14] sm:$0xff]  ;;  %p1252_p8 = pnand %p1251_p7, %p1245_p4 }
  0xcf   :  { %v918_v32 = vpack.c.bf16 %v384_v31, %v383_v30  ;;  %v472_v34 = vld [vmem:[#allocation14 + $0x8] sm:$0xff]  ;;  %v473_v35 = vld [vmem:[#allocation14 + $0x10] sm:$0xff]  ;;  %v474_v37 = vld [vmem:[#allocation14 + $0x18] sm:$0xff] }
  0xd0   :  { %777 = vmatpush3.msk.msra.mxu0 %vm279_vm3, %v184_v6  ;;  %v922_v36 = vpack.c.bf16 %v472_v34, %v471_v33  ;;  %v926_v38 = vpack.c.bf16 %v474_v37, %v473_v35  ;;  %v475_v39 = vld [vmem:[#allocation14 + $0x20] sm:$0xff]  ;;  %v476_v40 = vld [vmem:[#allocation14 + $0x28] sm:$0xff]  ;;  %v477_v42 = vld [vmem:[#allocation14 + $0x30] sm:$0xff] }
  0xd1   :  { %779 = vmatmul.mubr.msk.f32.vlgmr.msra.gmra.mrb[0].mxu0 %vm272_vm2, %v179_v16  ;;  %897 = vmatpush3.bf16.msra.mxu1 %v894_v13  ;;  %v930_v41 = vpack.c.bf16 %v476_v40, %v475_v39  ;;  %v478_v43 = vld [vmem:[#allocation14 + $0x38] sm:$0xff]  ;;  %v479_v45 = vld [vmem:[#allocation14 + $0x40] sm:$0xff]  ;;  %v480_v46 = vld [vmem:[#allocation14 + $0x48] sm:$0xff] }
  0xd2   :  { %899 = vmatprep.subr.bf16.mxu1 %v898_v17  ;;  %923 = vmatprep.subr.bf16.mxu0 %v922_v36  ;;  %v934_v44 = vpack.c.bf16 %v478_v43, %v477_v42  ;;  %v938_v47 = vpack.c.bf16 %v480_v46, %v479_v45  ;;  %v481_v48 = vld [vmem:[#allocation14 + $0x50] sm:$0xff]  ;;  %v482_v49 = vld [vmem:[#allocation14 + $0x58] sm:$0xff]  ;;  %v483_v58 = vld [vmem:[#allocation14 + $0x60] sm:$0xff] }
  0xd3   :  { %925 = vmatpush3.bf16.msra.mxu0 %v922_v36  ;;  %v942_v50 = vpack.c.bf16 %v482_v49, %v481_v48  ;;  %v701_v51 = vld [vmem:[#allocation10] ss:$0 sm:$0xff]  ;;  %v484_v59 = vld [vmem:[#allocation14 + $0x68] sm:$0xff]  ;;  %v485_v61 = vld [vmem:[#allocation14 + $0x70] sm:$0xff] }
  0xd4   :  { %927 = vmatprep.subr.bf16.mxu0 %v926_v38  ;;  %v946_v60 = vpack.c.bf16 %v484_v59, %v483_v58  ;;  %v486_v62 = vld [vmem:[#allocation14 + $0x78] sm:$0xff]  ;;  %v573_v0 = vld [vmem:[#allocation17] sm:$0xff]  ;;  %v574_v1 = vld [vmem:[#allocation17 + $0x8] sm:$0xff] }
  0xd5   :  { %901 = vmatpush3.bf16.msra.mxu1 %v898_v17  ;;  %v950_v63 = vpack.c.bf16 %v486_v62, %v485_v61  ;;  %v575_v2 = vld [vmem:[#allocation17 + $0x10] sm:$0xff]  ;;  %v954_v3 = vpack.c.bf16 %v574_v1, %v573_v0  ;;  %v576_v4 = vld [vmem:[#allocation17 + $0x18] sm:$0xff]  ;;  %v577_v6 = vld [vmem:[#allocation17 + $0x20] sm:$0xff] }
  0xd6   :  { %903 = vmatprep.subr.bf16.mxu1 %v902_v20  ;;  %v958_v5 = vpack.c.bf16 %v576_v4, %v575_v2  ;;  %v578_v7 = vld [vmem:[#allocation17 + $0x28] sm:$0xff]  ;;  %v579_v9 = vld [vmem:[#allocation17 + $0x30] sm:$0xff]  ;;  %v580_v10 = vld [vmem:[#allocation17 + $0x38] sm:$0xff] }
  0xd7   :  { %929 = vmatpush3.bf16.msra.mxu0 %v926_v38  ;;  %v962_v8 = vpack.c.bf16 %v578_v7, %v577_v6  ;;  %v966_v11 = vpack.c.bf16 %v580_v10, %v579_v9  ;;  %v581_v12 = vld [vmem:[#allocation17 + $0x40] sm:$0xff]  ;;  %v582_v13 = vld [vmem:[#allocation17 + $0x48] sm:$0xff]  ;;  %v583_v15 = vld [vmem:[#allocation17 + $0x50] sm:$0xff] }
  0xd8   :  { %931 = vmatprep.subr.bf16.mxu0 %v930_v41  ;;  %v970_v14 = vpack.c.bf16 %v582_v13, %v581_v12  ;;  %v584_v16 = vld [vmem:[#allocation17 + $0x58] sm:$0xff]  ;;  %v585_v27 = vld [vmem:[#allocation17 + $0x60] sm:$0xff]  ;;  %v586_v28 = vld [vmem:[#allocation17 + $0x68] sm:$0xff] }
  0xd9   :  { %905 = vmatpush3.bf16.msra.mxu1 %v902_v20  ;;  %v974_v17 = vpack.c.bf16 %v584_v16, %v583_v15  ;;  %v702_v18 = vld [vmem:[#allocation13] ss:$0 sm:$0xff]  ;;  %v587_v30 = vld [vmem:[#allocation17 + $0x70] sm:$0xff]  ;;  %v703_v33 = vld [vmem:[#allocation16] ss:$0 sm:$0xff] }
  0xda   :  { %907 = vmatprep.subr.bf16.mxu1 %v906_v23  ;;  %v588_v31 = vld [vmem:[#allocation17 + $0x78] sm:$0xff]  ;;  %v704_v42 = vld [vmem:[#allocation19] ss:$0 sm:$0xff] }
  0xdb   :  { %933 = vmatpush3.bf16.msra.mxu0 %v930_v41 }
  0xdc   :  { %935 = vmatprep.subr.bf16.mxu0 %v934_v44 }
  0xdd   :  { %909 = vmatpush3.bf16.msra.mxu1 %v906_v23 }
  0xde   :  { %911 = vmatprep.subr.bf16.mxu1 %v910_v26 }
  0xdf   :  { %937 = vmatpush3.bf16.msra.mxu0 %v934_v44 }
  0xe0   :  { %939 = vmatprep.subr.bf16.mxu0 %v938_v47 }
  0xe1   :  { %913 = vmatpush3.bf16.msra.mxu1 %v910_v26 }
  0xe2   :  { %915 = vmatprep.subr.bf16.mxu1 %v914_v29 }
  0xe3   :  { %941 = vmatpush3.bf16.msra.mxu0 %v938_v47 }
  0xe4   :  { %943 = vmatprep.subr.bf16.mxu0 %v942_v50 }
  0xe5   :  { %917 = vmatpush3.bf16.msra.mxu1 %v914_v29  ;;  %v978_v29 = vpack.c.bf16 %v586_v28, %v585_v27 }
  0xe6   :  { %919 = vmatprep.subr.bf16.mxu1 %v918_v32 }
  0xe7   :  { %945 = vmatpush3.bf16.msra.mxu0 %v942_v50 }
  0xe8   :  { %947 = vmatprep.subr.bf16.mxu0 %v946_v60 }
  0xe9   :  { %921 = vmatpush3.bf16.msra.mxu1 %v918_v32  ;;  %v982_v32 = vpack.c.bf16 %v588_v31, %v587_v30 }
  0xea   :  { %955 = vmatprep.subr.bf16.mxu1 %v954_v3 }
  0xeb   :  { %949 = vmatpush3.bf16.msra.mxu0 %v946_v60 }
  0xec   :  { %951 = vmatprep.subr.bf16.mxu0 %v950_v63 }
  0xef   :  { %953 = vmatpush3.bf16.msra.mxu0 %v950_v63 }
 0x1a4   :  { %v780_v52 = vpop.f32.mrb[0].mxu0 }
 0x1a5   :  { %v366_v53 = vadd.f32 %v780_v52, %v701_v51  ;;  %v349_v54 = vpop.f32.mrb[1].mxu0 }
 0x1a6   :  { %v365_v55 = vadd.f32 %v701_v51, %v349_v54 }
 0x1a7   :  { %v368_v57 = vmax.f32 %v366_v53, 0.0 }
 0x1a8   :  { %v367_v56 = vmax.f32 %v365_v55, 0.0 }
 0x1aa   :  { %813 = vmatprep.mubr.f32.mxu1 %v367_v56 }
 0x1ab   :  { %814 = vmatmul.mubr.f32.vlgmr.msra.gmra.mrb[0].mxu1 %v368_v57 }
 0x1ac   :  { %957 = vmatpush3.bf16.msra.mxu1 %v954_v3 }
 0x1ad   :  { %959 = vmatprep.subr.bf16.mxu1 %v958_v5 }
 0x1b0   :  { %961 = vmatpush3.bf16.msra.mxu1 %v958_v5 }
 0x1b1   :  { %963 = vmatprep.subr.bf16.mxu1 %v962_v8 }
 0x1b4   :  { %965 = vmatpush3.bf16.msra.mxu1 %v962_v8 }
 0x1b5   :  { %967 = vmatprep.subr.bf16.mxu1 %v966_v11 }
 0x1b8   :  { %969 = vmatpush3.bf16.msra.mxu1 %v966_v11 }
 0x1b9   :  { %971 = vmatprep.subr.bf16.mxu1 %v970_v14 }
 0x1bc   :  { %973 = vmatpush3.bf16.msra.mxu1 %v970_v14 }
 0x1bd   :  { %975 = vmatprep.subr.bf16.mxu1 %v974_v17 }
 0x1c0   :  { %977 = vmatpush3.bf16.msra.mxu1 %v974_v17 }
 0x1c1   :  { %979 = vmatprep.subr.bf16.mxu1 %v978_v29 }
 0x1c4   :  { %981 = vmatpush3.bf16.msra.mxu1 %v978_v29 }
 0x1c5   :  { %983 = vmatprep.subr.bf16.mxu1 %v982_v32 }
 0x1c8   :  { %985 = vmatpush3.bf16.msra.mxu1 %v982_v32 }
 0x27e   :  { %v815_v19 = vpop.f32.mrb[0].mxu1 }
 0x27f   :  { %v464_v20 = vadd.f32 %v815_v19, %v702_v18  ;;  %v458_v21 = vpop.f32.mrb[1].mxu1 }
 0x280   :  { %v459_v22 = vadd.f32 %v702_v18, %v458_v21 }
 0x281   :  { %v468_v23 = vadd.f32 %v464_v20, %v368_v57 }
 0x282   :  { %v467_v24 = vadd.f32 %v459_v22, %v367_v56 }
 0x283   :  { %v470_v26 = vmax.f32 %v468_v23, 0.0 }
 0x284   :  { %v469_v25 = vmax.f32 %v467_v24, 0.0 }
 0x286   :  { %848 = vmatprep.mubr.f32.mxu0 %v469_v25 }
 0x287   :  { %849 = vmatmul.mubr.f32.vlgmr.msra.gmra.mrb[2].mxu0 %v470_v26 }
 0x35a   :  { %v850_v34 = vpop.f32.mrb[2].mxu0 }
 0x35b   :  { %v566_v35 = vadd.f32 %v850_v34, %v703_v33  ;;  %v560_v36 = vpop.f32.mrb[3].mxu0 }
 0x35c   :  { %v561_v37 = vadd.f32 %v703_v33, %v560_v36 }
 0x35d   :  { %v570_v38 = vadd.f32 %v566_v35, %v470_v26 }
 0x35e   :  { %v569_v39 = vadd.f32 %v561_v37, %v469_v25 }
 0x35f   :  { %v572_v41 = vmax.f32 %v570_v38, 0.0 }
 0x360   :  { %v571_v40 = vmax.f32 %v569_v39, 0.0 }
 0x362   :  { %883 = vmatprep.mubr.f32.mxu1 %v571_v40 }
 0x363   :  { %884 = vmatmul.mubr.f32.vlgmr.msra.gmra.mrb[2].mxu1 %v572_v41 }
 0x436   :  { %v885_v43 = vpop.f32.mrb[2].mxu1 }
 0x437   :  { %v668_v44 = vadd.f32 %v885_v43, %v704_v42  ;;  %v662_v45 = vpop.f32.mrb[3].mxu1 }
 0x438   :  { %v663_v46 = vadd.f32 %v704_v42, %v662_v45 }
 0x439   :  { %672 = vst [vmem:[#allocation20 + $0x8] sm:$0xff] %v668_v44 }
 0x43a   :  { %671 = vst [vmem:[#allocation20] sm:$0xff] %v663_v46 }
 0x43b   :  { %1255 = shalt.err (!%p1252_p8)
}
 0x43c   :  { %s1256_s26 = scalar_lea.hbm %s1548_s11, 256 }
 0x43d   :  { %p1257_p9 = scmp.ne.s32.totalorder %s1548_s11, %s1256_s26  ;;  %p1260_p10 = scmp.lt.u32.totalorder %s1256_s26, %s1548_s11 }
 0x43f   :  { %p1262_p11 = pnand %p1260_p10, %p1257_p9 }
 0x441   :  { %1265 = shalt.err (!%p1262_p11)
}
 0x442   :  { %684 = dma.vmem_to_hbm [thread:$0]  %s679_s3, 256, %s1548_s11, [#allocation4], %s1282_s29, %s1282_s29, %s1283_s30  }
 0x443   :  { %1278 = dma.done.wait [#allocation4], 256  }
 0x444   :  { %1279 = vsyncadd [#allocation4], 4294967040 }
 0x445   :  { %688 = vsyncpa [#allocation3], 1 }
 0x446   :  { %689 = vsyncpa [#allocation6], 1 }
 0x447   :  { %690 = vsyncpa [#allocation9], 1 }
 0x448   :  { %691 = vsyncpa [#allocation12], 1 }
 0x449   :  { %692 = vsyncpa [#allocation15], 1 }
 0x44a   :  { %693 = vsyncpa [#allocation18], 1 }
 0x44b   :  { %694 = vsyncpa [#allocation4], 1 }

</bundles_post_ra>
